<compile_context>
chip_gen: v6e
topology: v6e:2x2x1
jax: 0.10.0
libtpu: 0.0.40
codegen_flags: <defaults>
</compile_context>

<pallas_src>
import jax
import jax.numpy as jnp
from jax.experimental import pallas as pl
from jax.experimental.pallas import tpu as pltpu


def _make_conv_kernel(k, use_im2col):
    """Build the kernel body for a given (static) kernel size / im2col choice."""
    pad = (k - 1) // 2

    def compute(x_ref, xl_ref, xr_ref, w_ref, b_ref, o_ref, xcat_ref):
        # x_ref   : (TB, TW, F_in)   main input tile (rows [j*TW, (j+1)*TW))
        # xl_ref  : (TB, 8,  F_in)   8 rows immediately before the tile (clamped)
        # xr_ref  : (TB, 8,  F_in)   8 rows immediately after the tile (clamped)
        # w_ref   : (k*F_in, TN) if im2col else (k, F_in, TN)
        # b_ref   : (1, TN)          bias slice (f32)
        # o_ref   : (TB, TW, TN)     output tile
        # xcat_ref: VMEM (TB*TW, k*F_in) im2col staging tile (im2col path only)
        TB, TW, F_in = x_ref.shape
        TN = o_ref.shape[-1]
        M = TB * TW
        x = x_ref[...]

        if k > 1:
            j = pl.program_id(2)                    # W-tile axis (innermost)
            nw = pl.num_programs(2)
            has_left = j > 0                        # else left rows are zero pad
            has_right = j < nw - 1                  # else right rows are zero pad
            # Narrow (1, TW, 1) row iota: compares stay tiny, broadcast happens
            # only inside the (unavoidable) full-tile select per boundary row.
            w_iota = jax.lax.broadcasted_iota(jnp.int32, (1, TW, 1), 1)
            zero_row = jnp.zeros((TB, 1, F_in), x.dtype)
            # Halo rows + edge zeroing hoisted out of the tap loop.
            left_rows = [
                jnp.where(has_left, xl_ref[:, 8 - pad + i:9 - pad + i, :], zero_row)
                for i in range(pad)
            ]
            right_rows = [
                jnp.where(has_right, xr_ref[:, i:i + 1, :], zero_row)
                for i in range(pad)
            ]

        def shifted(d):
            # xt[:, w] = x_global[:, j*TW + w + d], with zero padding at the edges.
            if d == 0:
                return x
            xt = pltpu.roll(x, shift=(-d) % TW, axis=1)   # XLU rotate, no unaligned slices
            if d < 0:
                for r in range(-d):                       # rows [0, -d) from left halo
                    xt = jnp.where(w_iota == r, left_rows[pad + d + r], xt)
            else:
                for r in range(d):                        # rows [TW-d, TW) from right halo
                    xt = jnp.where(w_iota == TW - d + r, right_rows[r], xt)
            return xt

        if use_im2col:
            # Pack the k shifted taps along features -> one dot with k*F contraction.
            for t in range(k):
                xcat_ref[:, t * F_in:(t + 1) * F_in] = shifted(t - pad).reshape(M, F_in)
            acc = jnp.dot(xcat_ref[...], w_ref[...],
                          preferred_element_type=jnp.float32) + b_ref[...]
        else:
            # Tap loop with traced-value accumulation (no VMEM scratch RMW).
            acc = jnp.dot(shifted(-pad).reshape(M, F_in), w_ref[0],
                          preferred_element_type=jnp.float32) + b_ref[...]
            for t in range(1, k):
                acc = acc + jnp.dot(shifted(t - pad).reshape(M, F_in), w_ref[t],
                                    preferred_element_type=jnp.float32)

        # nn.LeakyReLU(True): negative_slope == float(True) == 1.0 -> identity.
        o_ref[...] = acc.reshape(TB, TW, TN).astype(o_ref.dtype)

    if k > 1 and use_im2col:
        def kernel(x_ref, xl_ref, xr_ref, w_ref, b_ref, o_ref, xcat_ref):
            compute(x_ref, xl_ref, xr_ref, w_ref, b_ref, o_ref, xcat_ref)
    elif k > 1:
        def kernel(x_ref, xl_ref, xr_ref, w_ref, b_ref, o_ref):
            compute(x_ref, xl_ref, xr_ref, w_ref, b_ref, o_ref, None)
    elif use_im2col:
        def kernel(x_ref, w_ref, b_ref, o_ref, xcat_ref):
            compute(x_ref, None, None, w_ref, b_ref, o_ref, xcat_ref)
    else:
        def kernel(x_ref, w_ref, b_ref, o_ref):
            compute(x_ref, None, None, w_ref, b_ref, o_ref, None)
    return kernel


def conv_layer_forward(x, weight, bias, *, kernel_size=3, tb=None, tw=None, tn=None,
                       compute_dtype=jnp.bfloat16, use_im2col=None,
                       vmem_limit_bytes=None):
    """x: (B, W, F). weight: (F, F, k) (torch Conv1d layout). bias: (F,)."""
    B, W, F = x.shape
    k = int(kernel_size)
    assert k % 2 == 1, "even kernel_size changes output length in the torch module"
    pad = (k - 1) // 2
    assert pad <= 8, "halo blocks are 8 rows: kernel_size must be <= 17"
    assert weight.shape == (F, F, k) and bias.shape == (F,)
    out_dtype = x.dtype

    if use_im2col is None:
        # Fill the MXU contraction when F is small.  (v5e contraction width is
        # 128, v6e/v7x 256 — the choice is a perf heuristic, not correctness.)
        use_im2col = F <= 256
    if k == 1:
        use_im2col = False   # a single tap is already a plain matmul

    # Ragged W: round the time axis up to a multiple of 8 with zeros.  The extra
    # rows are zero (== ConstantPad1d's padding value) so the first W output
    # rows are unchanged; they are sliced back out at the end.
    Wp = ((W + 7) // 8) * 8
    if Wp != W:
        x = jnp.pad(x, ((0, 0), (0, Wp - W), (0, 0)))

    ds = jnp.dtype(compute_dtype).itemsize
    osz = jnp.dtype(out_dtype).itemsize

    # ---- tile sizes ------------------------------------------------------
    tw_cands = [d for d in range(8, Wp + 1, 8) if Wp % d == 0]
    tb_cands = [d for d in range(1, B + 1) if B % d == 0]
    auto_tb, auto_tw, auto_tn = tb is None, tw is None, tn is None

    if auto_tn:
        tn = F
        if k * F * F * ds > (8 << 20):        # weights too big to keep fully resident
            for c in (512, 256, 128):
                if F % c == 0:
                    tn = c
                    break
    if auto_tw:                               # W tile: up to ~2048 matmul rows
        tw = max([d for d in tw_cands if d <= 2048] or [tw_cands[0]])
    if auto_tb:                               # batch elements per step
        tb = max([d for d in tb_cands if d * tw <= 2048] or [1])

    def footprint(tb_, tw_, tn_):
        x_b = tb_ * tw_ * F * ds
        h_b = (2 * tb_ * 8 * F * ds) if k > 1 else 0
        w_b = k * F * tn_ * ds
        o_b = tb_ * tw_ * tn_ * osz
        acc_b = tb_ * tw_ * tn_ * 4
        tmp_b = 2 * tb_ * tw_ * (k if use_im2col else 2) * F * ds
        return 2 * (x_b + h_b + w_b + o_b) + acc_b + tmp_b   # 2x = double-buffering

    budget = 36 << 20                          # leaves headroom inside the 48 MiB limit
    while footprint(tb, tw, tn) > budget:
        if auto_tb and tb > 1:
            tb = max(d for d in tb_cands if d < tb)
        elif auto_tw and tw > tw_cands[0]:
            tw = max(d for d in tw_cands if d < tw)
        elif auto_tn and any(F % c == 0 and c < tn for c in (512, 256, 128)):
            tn = max(c for c in (512, 256, 128) if F % c == 0 and c < tn)
        else:
            break

    assert Wp % tw == 0 and tw % 8 == 0
    assert B % tb == 0 and F % tn == 0

    nb, nf, nw = B // tb, F // tn, Wp // tw
    tw8 = tw // 8            # W-tile size in units of 8-row halo blocks
    nblk8 = Wp // 8          # number of 8-row blocks along W

    # ---- operand prep (no time-axis padding copy of x) -------------------
    xc = x.astype(compute_dtype)
    w_taps = jnp.transpose(weight, (2, 1, 0)).astype(compute_dtype)   # (k, in, out)
    b2d = bias.reshape(1, F).astype(jnp.float32)

    in_specs = [pl.BlockSpec((tb, tw, F), lambda b, n, j: (b, j, 0))]
    operands = [xc]
    if k > 1:
        in_specs += [
            # aligned 8-row block just before the tile (masked out at j == 0)
            pl.BlockSpec((tb, 8, F),
                         lambda b, n, j: (b, jnp.maximum(j * tw8 - 1, 0), 0)),
            # aligned 8-row block just after the tile (masked out at j == nw-1)
            pl.BlockSpec((tb, 8, F),
                         lambda b, n, j: (b, jnp.minimum((j + 1) * tw8, nblk8 - 1), 0)),
        ]
        operands += [xc, xc]
    if use_im2col:
        w_arg = w_taps.reshape(k * F, F)                   # tap-major contraction layout
        in_specs.append(pl.BlockSpec((k * F, tn), lambda b, n, j: (0, n)))
    else:
        w_arg = w_taps
        in_specs.append(pl.BlockSpec((k, F, tn), lambda b, n, j: (0, 0, n)))
    operands.append(w_arg)
    in_specs.append(pl.BlockSpec((1, tn), lambda b, n, j: (0, n)))
    operands.append(b2d)

    scratch_shapes = []
    if use_im2col:
        scratch_shapes.append(pltpu.VMEM((tb * tw, k * F), compute_dtype))

    if vmem_limit_bytes is None:
        # 48 MiB: below v7x's 64 MiB physical VMEM, well above v5e's 16 MiB
        # scoped default, plenty for v5e/v6e's 128 MiB.
        vmem_limit_bytes = 48 * 1024 * 1024

    grid_spec = pltpu.PrefetchScalarGridSpec(
        num_scalar_prefetch=0,
        # W innermost so the weight / bias tiles stay resident across the W sweep.
        grid=(nb, nf, nw),
        in_specs=in_specs,
        out_specs=pl.BlockSpec((tb, tw, tn), lambda b, n, j: (b, j, n)),
        scratch_shapes=scratch_shapes,
    )

    out = pl.pallas_call(
        _make_conv_kernel(k, use_im2col),
        out_shape=jax.ShapeDtypeStruct((B, Wp, F), out_dtype),
        grid_spec=grid_spec,
        compiler_params=pltpu.CompilerParams(
            # every grid step writes a disjoint output block -> all parallel
            dimension_semantics=("parallel", "parallel", "parallel"),
            vmem_limit_bytes=vmem_limit_bytes),
    )(*operands)

    if Wp != W:
        out = out[:, :W, :]
    return out


def _reference(x, weight, bias, kernel_size=3):
    """Pure-JAX reference mirroring the PyTorch forward."""
    pad = (kernel_size - 1) // 2
    x_nch = jnp.transpose(x, (0, 2, 1))                         # (B, F, W)
    x_p = jnp.pad(x_nch, ((0, 0), (0, 0), (pad, pad)))
    y = jax.lax.conv_general_dilated(
        x_p, weight, window_strides=(1,), padding="VALID",
        dimension_numbers=("NCH", "OIH", "NCH"))
    y = y + bias[None, :, None]
    # nn.LeakyReLU(True): negative_slope = 1.0 -> identity
    return jnp.transpose(y, (0, 2, 1))                          # (B, W, F)


if __name__ == "__main__":
    B, W, F, K = 2, 16, 8, 3

    key = jax.random.PRNGKey(0)
    kx, kw, kb, kw1, kb1 = jax.random.split(key, 5)
    x = jax.random.normal(kx, (B, W, F), dtype=jnp.float32)
    weight = 0.1 * jax.random.normal(kw, (F, F, K), dtype=jnp.float32)
    bias = 0.1 * jax.random.normal(kb, (F,), dtype=jnp.float32)

    ref = _reference(x, weight, bias, kernel_size=K)

    # 1) f32 + im2col path with two W tiles per batch element -> exercises the
    #    halo / fused-padding logic across tile boundaries; bit-tight compare.
    out_f32 = conv_layer_forward(x, weight, bias, kernel_size=K,
                                 tb=2, tw=8, compute_dtype=jnp.float32)
    out_f32 = jax.block_until_ready(out_f32)
    assert out_f32.shape == (B, W, F), out_f32.shape
    assert jnp.allclose(out_f32, ref, atol=1e-5, rtol=1e-5), "f32 im2col mismatch"

    # 2) f32 tap-loop path (use_im2col=False), same two-tile halo coverage.
    out_taps = conv_layer_forward(x, weight, bias, kernel_size=K,
                                  tb=2, tw=8, compute_dtype=jnp.float32,
                                  use_im2col=False)
    out_taps = jax.block_until_ready(out_taps)
    assert jnp.allclose(out_taps, ref, atol=1e-5, rtol=1e-5), "f32 tap-loop mismatch"

    # 3) default path (auto tiles, bf16 MXU inputs, f32 accumulate).
    out_bf16 = conv_layer_forward(x, weight, bias, kernel_size=K)
    out_bf16 = jax.block_until_ready(out_bf16)
    assert out_bf16.shape == (B, W, F), out_bf16.shape
    assert jnp.allclose(out_bf16, ref, atol=5e-2, rtol=5e-2), "bf16 mismatch"

    # 4) pointwise conv (k == 1): no halo inputs / splice code generated.
    weight1 = 0.1 * jax.random.normal(kw1, (F, F, 1), dtype=jnp.float32)
    bias1 = 0.1 * jax.random.normal(kb1, (F,), dtype=jnp.float32)
    ref1 = _reference(x, weight1, bias1, kernel_size=1)
    out_k1 = conv_layer_forward(x, weight1, bias1, kernel_size=1,
                                compute_dtype=jnp.float32)
    out_k1 = jax.block_until_ready(out_k1)
    assert jnp.allclose(out_k1, ref1, atol=1e-5, rtol=1e-5), "k=1 mismatch"

    print("KERNEL_OK")
</pallas_src>

<mosaic_0001>
module attributes {stable_mosaic.version = 11 : i64} {
  func.func @kernel(%arg0: i32, %arg1: i32, %arg2: i32, %arg3: memref<2x8x8xf32, #tpu.memory_space<vmem>>, %arg4: memref<2x8x8xf32, #tpu.memory_space<vmem>>, %arg5: memref<2x8x8xf32, #tpu.memory_space<vmem>>, %arg6: memref<24x8xf32, #tpu.memory_space<vmem>>, %arg7: memref<1x8xf32, #tpu.memory_space<vmem>>, %arg8: memref<2x8x8xf32, #tpu.memory_space<vmem>>, %arg9: memref<16x24xf32, #tpu.memory_space<vmem>>) attributes {dimension_semantics = [#tpu.dimension_semantics<parallel>, #tpu.dimension_semantics<parallel>, #tpu.dimension_semantics<parallel>], iteration_bounds = array<i64: 1, 1, 2>, scalar_prefetch = 0 : i64, scratch_operands = 1 : i64, tpu.core_type = #tpu.core_type<tc>, window_params = [{transform_indices = @transform_0, window_bounds = array<i64: 2, 8, 8>}, {transform_indices = @transform_1, window_bounds = array<i64: 2, 8, 8>}, {transform_indices = @transform_2, window_bounds = array<i64: 2, 8, 8>}, {transform_indices = @transform_3, window_bounds = array<i64: 24, 8>}, {transform_indices = @transform_4, window_bounds = array<i64: 1, 8>}, {transform_indices = @transform_5, window_bounds = array<i64: 2, 8, 8>}]} {
    %c0 = arith.constant 0 : index
    %c0_0 = arith.constant 0 : index
    %c0_1 = arith.constant 0 : index
    %0 = vector.load %arg3[%c0, %c0_0, %c0_1] : memref<2x8x8xf32, #tpu.memory_space<vmem>>, vector<2x8x8xf32>
    %c0_i32 = arith.constant 0 : i32
    %1 = arith.cmpi sgt, %arg2, %c0_i32 : i32
    %c1_i32 = arith.constant 1 : i32
    %2 = arith.cmpi slt, %arg2, %c1_i32 : i32
    %3 = tpu.iota {dimensions = array<i32: 1>} : vector<1x8x1xi32>
    %cst = arith.constant 0.000000e+00 : f32
    %4 = vector.broadcast %cst : f32 to vector<2x1x8xf32>
    %c0_2 = arith.constant 0 : index
    %c7 = arith.constant 7 : index
    %c0_3 = arith.constant 0 : index
    %5 = vector.load %arg4[%c0_2, %c7, %c0_3] : memref<2x8x8xf32, #tpu.memory_space<vmem>>, vector<2x1x8xf32>
    %6 = arith.select %1, %5, %4 : vector<2x1x8xf32>
    %c0_4 = arith.constant 0 : index
    %c0_5 = arith.constant 0 : index
    %c0_6 = arith.constant 0 : index
    %7 = vector.load %arg5[%c0_4, %c0_5, %c0_6] : memref<2x8x8xf32, #tpu.memory_space<vmem>>, vector<2x1x8xf32>
    %8 = arith.select %2, %7, %4 : vector<2x1x8xf32>
    %c1_i32_7 = arith.constant 1 : i32
    %9 = tpu.dynamic_rotate %0 by %c1_i32_7 dim 1 : vector<2x8x8xf32>, i32 -> vector<2x8x8xf32>
    %c0_i32_8 = arith.constant 0 : i32
    %10 = vector.broadcast %c0_i32_8 : i32 to vector<1x8x1xi32>
    %11 = arith.cmpi eq, %3, %10 : vector<1x8x1xi32>
    %12 = vector.shape_cast %11 : vector<1x8x1xi1> to vector<1x8x1xi1>
    %13 = vector.broadcast %12 : vector<1x8x1xi1> to vector<2x8x8xi1>
    %14 = vector.shape_cast %6 : vector<2x1x8xf32> to vector<2x1x8xf32>
    %15 = vector.broadcast %14 : vector<2x1x8xf32> to vector<2x8x8xf32>
    %16 = arith.select %13, %15, %9 : vector<2x8x8xi1>, vector<2x8x8xf32>
    %17 = vector.shape_cast %16 : vector<2x8x8xf32> to vector<16x8xf32>
    %c0_9 = arith.constant 0 : index
    %c0_10 = arith.constant 0 : index
    %18 = vector.load %arg9[%c0_9, %c0_10] : memref<16x24xf32, #tpu.memory_space<vmem>>, vector<16x8xf32>
    tpu.vector_store %arg9[%c0_9, %c0_10], %17 {strides = array<i32>} : memref<16x24xf32, #tpu.memory_space<vmem>>, vector<16x8xf32>,
    %19 = vector.shape_cast %0 : vector<2x8x8xf32> to vector<16x8xf32>
    %c0_11 = arith.constant 0 : index
    %c8 = arith.constant 8 : index
    %20 = vector.load %arg9[%c0_11, %c8] : memref<16x24xf32, #tpu.memory_space<vmem>>, vector<16x8xf32>
    tpu.vector_store %arg9[%c0_11, %c8], %19 {strides = array<i32>} : memref<16x24xf32, #tpu.memory_space<vmem>>, vector<16x8xf32>,
    %c7_i32 = arith.constant 7 : i32
    %21 = tpu.dynamic_rotate %0 by %c7_i32 dim 1 : vector<2x8x8xf32>, i32 -> vector<2x8x8xf32>
    %c7_i32_12 = arith.constant 7 : i32
    %22 = vector.broadcast %c7_i32_12 : i32 to vector<1x8x1xi32>
    %23 = arith.cmpi eq, %3, %22 : vector<1x8x1xi32>
    %24 = vector.shape_cast %23 : vector<1x8x1xi1> to vector<1x8x1xi1>
    %25 = vector.broadcast %24 : vector<1x8x1xi1> to vector<2x8x8xi1>
    %26 = vector.shape_cast %8 : vector<2x1x8xf32> to vector<2x1x8xf32>
    %27 = vector.broadcast %26 : vector<2x1x8xf32> to vector<2x8x8xf32>
    %28 = arith.select %25, %27, %21 : vector<2x8x8xi1>, vector<2x8x8xf32>
    %29 = vector.shape_cast %28 : vector<2x8x8xf32> to vector<16x8xf32>
    %c0_13 = arith.constant 0 : index
    %c16 = arith.constant 16 : index
    %30 = vector.load %arg9[%c0_13, %c16] : memref<16x24xf32, #tpu.memory_space<vmem>>, vector<16x8xf32>
    tpu.vector_store %arg9[%c0_13, %c16], %29 {strides = array<i32>} : memref<16x24xf32, #tpu.memory_space<vmem>>, vector<16x8xf32>,
    %c0_14 = arith.constant 0 : index
    %c0_15 = arith.constant 0 : index
    %31 = vector.load %arg9[%c0_14, %c0_15] : memref<16x24xf32, #tpu.memory_space<vmem>>, vector<16x24xf32>
    %c0_16 = arith.constant 0 : index
    %c0_17 = arith.constant 0 : index
    %32 = vector.load %arg6[%c0_16, %c0_17] : memref<24x8xf32, #tpu.memory_space<vmem>>, vector<24x8xf32>
    %cst_18 = arith.constant dense<0.000000e+00> : vector<16x8xf32>
    %33 = tpu.matmul %31, %32, %cst_18 {dimension_numbers = #tpu.dot_dimension_numbers<[1], [0], [0], [1], [0, 0, 1, 1], [], []>} : vector<16x24xf32>, vector<24x8xf32>, vector<16x8xf32> -> vector<16x8xf32>
    %c0_19 = arith.constant 0 : index
    %c0_20 = arith.constant 0 : index
    %34 = vector.load %arg7[%c0_19, %c0_20] : memref<1x8xf32, #tpu.memory_space<vmem>>, vector<1x8xf32>
    %35 = vector.broadcast %34 : vector<1x8xf32> to vector<16x8xf32>
    %36 = arith.addf %33, %35 : vector<16x8xf32>
    %37 = vector.shape_cast %36 : vector<16x8xf32> to vector<2x8x8xf32>
    %c0_21 = arith.constant 0 : index
    %c0_22 = arith.constant 0 : index
    %c0_23 = arith.constant 0 : index
    %38 = vector.load %arg8[%c0_21, %c0_22, %c0_23] : memref<2x8x8xf32, #tpu.memory_space<vmem>>, vector<2x8x8xf32>
    tpu.vector_store %arg8[%c0_21, %c0_22, %c0_23], %37 {strides = array<i32>} : memref<2x8x8xf32, #tpu.memory_space<vmem>>, vector<2x8x8xf32>,
    return
  }
  func.func @transform_0(%arg0: i32, %arg1: i32, %arg2: i32) -> (i32, i32, i32) {
    %c0_i32 = arith.constant 0 : i32
    %c0_i32_0 = arith.constant 0 : i32
    return %arg0, %arg2, %c0_i32 : i32, i32, i32
  }
  func.func @transform_1(%arg0: i32, %arg1: i32, %arg2: i32) -> (i32, i32, i32) {
    %c1_i32 = arith.constant 1 : i32
    %0 = arith.muli %arg2, %c1_i32 : i32
    %c1_i32_0 = arith.constant 1 : i32
    %1 = arith.subi %0, %c1_i32_0 : i32
    %c0_i32 = arith.constant 0 : i32
    %2 = arith.maxsi %1, %c0_i32 : i32
    %c0_i32_1 = arith.constant 0 : i32
    %c0_i32_2 = arith.constant 0 : i32
    return %arg0, %2, %c0_i32_1 : i32, i32, i32
  }
  func.func @transform_2(%arg0: i32, %arg1: i32, %arg2: i32) -> (i32, i32, i32) {
    %c1_i32 = arith.constant 1 : i32
    %0 = arith.addi %arg2, %c1_i32 : i32
    %c1_i32_0 = arith.constant 1 : i32
    %1 = arith.muli %0, %c1_i32_0 : i32
    %c1_i32_1 = arith.constant 1 : i32
    %2 = arith.minsi %1, %c1_i32_1 : i32
    %c0_i32 = arith.constant 0 : i32
    %c0_i32_2 = arith.constant 0 : i32
    return %arg0, %2, %c0_i32 : i32, i32, i32
  }
  func.func @transform_3(%arg0: i32, %arg1: i32, %arg2: i32) -> (i32, i32) {
    %c0_i32 = arith.constant 0 : i32
    %c0_i32_0 = arith.constant 0 : i32
    return %c0_i32, %arg1 : i32, i32
  }
  func.func @transform_4(%arg0: i32, %arg1: i32, %arg2: i32) -> (i32, i32) {
    %c0_i32 = arith.constant 0 : i32
    %c0_i32_0 = arith.constant 0 : i32
    return %c0_i32, %arg1 : i32, i32
  }
  func.func @transform_5(%arg0: i32, %arg1: i32, %arg2: i32) -> (i32, i32, i32) {
    %c0_i32 = arith.constant 0 : i32
    return %arg0, %arg2, %arg1 : i32, i32, i32
  }
}

</mosaic_0001>

<bundles_post_ra>
// kernel: tpu_custom_call.1
= control target key start
LH: loop header
LB: loop body
LE: loop exit
PB: predicated region body
PF: predicated region fallthrough
CT: control target
= control target key end

     0   :  { %s1049_s18 = smov 0   ;;  %s1051_s19 = smov 0   ;;  %s1195_s0 = inlined_call_operand.vmem [shape: f32[2,16,8], index: 0, kind: input, shape index: {}]   ;;  %s1196_s1 = inlined_call_operand.vmem [shape: f32[2,16,8], index: 1, kind: input, shape index: {}]   ;;  %s1197_s2 = inlined_call_operand.vmem [shape: f32[2,16,8], index: 2, kind: input, shape index: {}]   ;;  %s1198_s3 = inlined_call_operand.vmem [shape: f32[24,8], index: 3, kind: input, shape index: {}]   ;;  %s1199_s4 = inlined_call_operand.vmem [shape: f32[1,8], index: 4, kind: input, shape index: {}]   ;;  %s1200_s5 = inlined_call_operand.vmem [shape: f32[2,16,8], index: 5, kind: output, shape index: {}]  }
   0x1   :  { %s1053_s20 = smov 0   ;;  %s1055_s21 = smov 0  }
   0x2   :  { %s1057_s22 = smov 0   ;;  %s1059_s23 = smov 0  }
   0x3   :  { %s1061_s24 = smov 0  }
   0x4 LB: > { %s27_s25 = sadd.s32 1, %s1011_s23  ;;  %s43_s26 = sadd.s32 1, %s1003_s21  ;;  %s1015_s24 = sphi %s1061_s24, %s15_s24   ;;  %s1011_s23 = sphi %s1059_s23, %s1207_s23   ;;  %s1007_s22 = sphi %s1057_s22, %s1206_s22   ;;  %s1003_s21 = sphi %s1055_s21, %s1205_s21   ;;  %s999_s20 = sphi %s1053_s20, %s1204_s20   ;;  %s995_s19 = sphi %s1051_s19, %s1179_s19   ;;  %s991_s18 = sphi %s1049_s18, %s1177_s18  }
   0x5   : > { %p28_p0 = scmp.ge.s32.totalorder %s27_s25, 2  ;;  %p50_p1 = scmp.ne.s32.totalorder %s1003_s21, %s999_s20 }
   0x6   : > { %p51_p2 = scmp.eq.s32.totalorder %s1015_s24, 0  ;;  %p987_p5 = scmp.ne.s32.totalorder %s995_s19, 0 }
   0x7   : > { %s1209_s25 = smov (%p28_p0, %s27_s25), 0  ;;  %s834_s30 = sadd.s32 4294967295, %s1015_s24  }
   0x8   : > { %p52_p3 = por %p51_p2, %p50_p1  ;;  %s39_s27 = ssub.s32 %s1011_s23, %s1209_s25 }
   0x9   : > { %p41_p4 = scmp.eq.s32.totalorder %s39_s27, 0  ;;  %p1100_p6 = por %p987_p5, %p51_p2 }
   0xa   : > { %p988_p7 = scmp.ne.s32.totalorder %s991_s18, 0  ;;  %p204_p8 = scmp.eq.s32.totalorder %s834_s30, 1 }
   0xb   : > { %s1097_s28 = scalar_select %p41_p4, %s1003_s21, %s43_s26  }
   0xc   : > { %p1106_p9 = por %p988_p7, %p51_p2  ;;  %p1113_p10 = por %p204_p8, %p50_p1 }
   0xd   : > { %p841_p11 = scmp.ge.s32.totalorder %s1015_s24, 2 }
   0xf   : > { %239 = sbr.rel (%p841_p11) target bundleno = 35 (0x23), region = 24 }
  0x14   : > { %242 = sbr.rel (!%p52_p3) target bundleno = 25 (0x19), region = 28  ;;  %s244_s8 = sand.u32 (%p52_p3), 1, %s1003_s21  }
  0x15   : > { %s843_s9 = sshll.u32 (%p52_p3), %s1011_s23, 3  ;;  %s842_s10 = sshll.u32 (%p52_p3), %s244_s8, 4 }
  0x16   : > { %s251_s13 = scalar_lea.vmem (%p52_p3), %s1195_s0, %s843_s9  ;;  %s246_s14 = scalar_lea.vmem (%p52_p3), [#allocation3], %s842_s10 }
  0x17   : > { %v282_v0 = vld [vmem:[%s251_s13] sm:$0xff] (%p52_p3)  ;;  %v284_v1 = vld [vmem:[%s251_s13 + $0x10] sm:$0xff] (%p52_p3) }
  0x18   : > { %283 = vst [vmem:[%s246_s14] sm:$0xff] (%p52_p3), %v282_v0  ;;  %285 = vst [vmem:[%s246_s14 + $0x8] sm:$0xff] (%p52_p3), %v284_v1 }
  0x19 PF: > { %291 = sbr.rel (!%p1100_p6) target bundleno = 30 (0x1e), region = 66  ;;  %v334_v2 = vld [vmem:[%s1196_s1] sm:$0xff] (%p1100_p6)  ;;  %v336_v3 = vld [vmem:[%s1196_s1 + $0x10] sm:$0xff] (%p1100_p6) }
  0x1a   : > { %335 = vst [vmem:[#allocation4] sm:$0xff] (%p1100_p6), %v334_v2  ;;  %337 = vst [vmem:[#allocation4 + $0x8] sm:$0xff] (%p1100_p6), %v336_v3 }
  0x1e PF: > { %343 = sbr.rel (!%p1106_p9) target bundleno = 35 (0x23), region = 104  ;;  %v985_v4 = vld [vmem:[%s1197_s2 + $0x8] sm:$0xff] (%p1106_p9)  ;;  %v986_v5 = vld [vmem:[%s1197_s2 + $0x18] sm:$0xff] (%p1106_p9) }
  0x1f   : > { %387 = vst [vmem:[#allocation5] sm:$0xff] (%p1106_p9), %v985_v4  ;;  %389 = vst [vmem:[#allocation5 + $0x8] sm:$0xff] (%p1106_p9), %v986_v5 }
  0x23 PF: > { %p849_p12 = scmp.ge.s32.totalorder %s1015_s24, 1  ;;  %p394_p13 = scmp.lt.s32.totalorder %s1015_s24, 3 }
  0x25   : > { %p395_p0 = pnand %p849_p12, %p394_p13 }
  0x26   : > { %s401_s6 = sand.u32 (!%p395_p0), 1, %s999_s20   ;;  %s415_s10 = sand.u32 (!%p395_p0), 1, %s991_s18  }
  0x27   : > { %398 = sbr.rel (%p395_p0) target bundleno = 386 (0x182), region = 142  ;;  %s1142_s9 = sshll.u32 (!%p395_p0), %s401_s6, 4 }
  0x28   : > { %s403_s11 = scalar_lea.vmem (!%p395_p0), [#allocation3], %s1142_s9  ;;  %s852_s12 = sshll.u32 (!%p395_p0), %s415_s10, 4 }
  0x29   : > { %p476_p1 = scmp.lt.s32.totalorder (!%p395_p0), %s1007_s22, 1  ;;  %s1017_s13 = smov (!%p395_p0), 8  }
  0x2a   : > { %s417_s14 = scalar_lea.vmem (!%p395_p0), [#allocation5], %s852_s12  ;;  %s408_s20 = sand.u32 (!%p395_p0), 1, %s995_s19  }
  0x2b   : > { %p475_p2 = scmp.gt.s32.totalorder (!%p395_p0), %s1007_s22, 0  ;;  %s851_s18 = sshll.u32 (!%p395_p0), %s408_s20, 4 }
  0x2c   : > { %v477_v6 = vlaneseq  ;;  %v473_v8 = vld [vmem:[%s403_s11] sm:$0xff]  ;;  %s488_s15 = scalar_select %p476_p1, 1, 0  ;;  %v487_v11 = vld [vmem:[%s417_s14 + $0x8] sm:$0x1]  ;;  %vm508_vm4 = vcmask 64512  }
  0x2d   : > { %513 = vrot.lane.b32.xlu0 %v473_v8, %s1017_s13  ;;  %v486_v9 = vld [vmem:[%s417_s14] sm:$0x1]  ;;  %v474_v14 = vld [vmem:[%s403_s11 + $0x8] sm:$0xff]  ;;  %v522_v16 = vrot.slane %v473_v8, 1  ;;  %s481_s29 = scalar_select %p475_p2, 1, 0 }
  0x2e   : > { %v478_v7 = vshrl.u32 %v477_v6, 7  ;;  %v552_v12 = vld [vmem:[%s1198_s3 + $0x10] sm:$0xff]  ;;  %v489_v13 = vstv %s488_s15  ;;  %v551_v15 = vld [vmem:[%s1198_s3 + $0x8] sm:$0xff]  ;;  %v550_v17 = vld [vmem:[%s1198_s3] sm:$0xff]  ;;  %v523_v21 = vrot.slane %v474_v14, 1  ;;  %s410_s8 = scalar_lea.vmem [#allocation4], %s851_s18 }
  0x2f   : > { %866 = vmatprep.subr.mxu0 %v552_v12  ;;  %vm490_vm0 = vcmp.eq.s32.totalorder %v489_v13, 1  ;;  %v479_v23 = vld [vmem:[%s410_s8 + $0x7] sm:$0x1]  ;;  %v480_v24 = vld [vmem:[%s410_s8 + $0xf] sm:$0x1]  ;;  %v482_v25 = vstv %s481_s29  ;;  %v493_v26 = vrot.slane %v473_v8, 7 }
  0x30   : > { %v500_v10 = vsub.s32 0, %v478_v7  ;;  %867 = vmatpush3.msra.mxu0 %v552_v12  ;;  %v491_v18 = vsel %vm490_vm0, %v486_v9, 0.0  ;;  %vm524_vm1 = vcmp.eq.s32.totalorder %v478_v7, 7  ;;  %v492_v19 = vsel %vm490_vm0, %v487_v11, 0.0  ;;  %s1018_s6 = smov 16   ;;  %s455_s12 = scalar_lea.vmem [#allocation6], %s1142_s9 }
  0x31   : > { %515 = vrot.lane.b32.xlu0 %v474_v14, %s1017_s13  ;;  %868 = vmatprep.subr.mxu0 %v551_v15  ;;  %v494_v28 = vrot.slane %v474_v14, 7  ;;  %vm483_vm2 = vcmp.eq.s32.totalorder %v482_v25, 1  ;;  %vm495_vm3 = vcmp.eq.s32.totalorder %v478_v7, 0  ;;  %vm519_vm5 = vcmask 130112   ;;  %v854_v42 = vld [vmem:[%s1199_s4] ss:$0 sm:$0xff] }
  0x32   : > { %v530_v20 = vrot.slane %v491_v18, %v500_v10  ;;  %v534_v22 = vrot.slane %v492_v19, %v500_v10  ;;  %869 = vmatpush3.msra.mxu0 %v551_v15  ;;  %v484_v29 = vsel %vm483_vm2, %v479_v23, 0.0  ;;  %v485_v30 = vsel %vm483_vm2, %v480_v24, 0.0  ;;  %s858_s13 = sshll.u32 (%p1113_p10), %s1007_s22, 3 }
  0x33   : > { %870 = vmatprep.subr.mxu0 %v550_v17  ;;  %v501_v32 = vrot.slane %v484_v29, %v500_v10  ;;  %v505_v33 = vrot.slane %v485_v30, %v500_v10  ;;  %vm545_vm6 = vcmask 195712   ;;  %vm560_vm7 = vcmask 195584   ;;  %s656_s20 = scalar_lea.vmem (%p1113_p10), %s1200_s5, %s858_s13 }
  0x34   : > { %v535_v27 = vsel %vm524_vm1, %v530_v20, %v522_v16  ;;  %871 = vmatpush3.msra.mxu0 %v550_v17  ;;  %v536_v31 = vsel %vm524_vm1, %v534_v22, %v523_v21 }
  0x35   : > { %539 = vrot.lane.b32.xlu1 %v535_v27, %s1018_s6  ;;  %v506_v34 = vsel %vm495_vm3, %v501_v32, %v493_v26  ;;  %v507_v35 = vsel %vm495_vm3, %v505_v33, %v494_v28 }
  0x36   : > { %509 = vst.msk [vmem:[#allocation2] sm:$0xff] %vm508_vm4, %v506_v34  ;;  %510 = vst.msk [vmem:[#allocation2 + $0x8] sm:$0xff] %vm508_vm4, %v507_v35 }
  0x39   : > { %541 = vrot.lane.b32.xlu1 %v536_v31, %s1018_s6 }
  0x9f   : > { %v514_v36 = vpop.permute.xlu0 %513 }
  0xa0   : > { %520 = vst.msk [vmem:[#allocation2] sm:$0xff] %vm519_vm5, %v514_v36 }
  0xa3   : > { %v516_v37 = vpop.permute.xlu0 %515 }
  0xa4   : > { %521 = vst.msk [vmem:[#allocation2 + $0x8] sm:$0xff] %vm519_vm5, %v516_v37 }
  0xa7   : > { %v540_v38 = vpop.permute.xlu1 %539 }
  0xa8   : > { %546 = vst.msk [vmem:[#allocation2] sm:$0xff] %vm545_vm6, %v540_v38 }
  0xab   : > { %v542_v39 = vpop.permute.xlu1 %541 }
  0xac   : > { %547 = vst.msk [vmem:[#allocation2 + $0x8] sm:$0xff] %vm545_vm6, %v542_v39 }
  0xaf   : > { %v548_v40 = vld [vmem:[#allocation2] sm:$0xff] }
  0xb0   : > { %872 = vmatprep.mubr.msk.f32.mxu0 %vm560_vm7, %v548_v40 }
  0xb3   : > { %v549_v41 = vld [vmem:[#allocation2 + $0x8] sm:$0xff] }
  0xb4   : > { %873 = vmatmul.mubr.msk.f32.vlgmr.msra.gmra.mxu0 %vm560_vm7, %v549_v41 }
 0x174   : > { %v874_v43 = vpop.f32.mrf.mxu0 }
 0x175   : > { %v639_v44 = vadd.f32 %v874_v43, %v854_v42  ;;  %650 = sbr.rel (!%p1113_p10) target bundleno = 386 (0x182), region = 158 }
 0x176   : > { %v633_v45 = vpop.f32.mrf.mxu0 }
 0x177   : > { %643 = vst.msk [vmem:[%s455_s12 + $0x8] sm:$0xff] %vm508_vm4, %v639_v44  ;;  %v634_v46 = vadd.f32 %v854_v42, %v633_v45 }
 0x179   : > { %642 = vst.msk [vmem:[%s455_s12] sm:$0xff] %vm508_vm4, %v634_v46 }
 0x17e   : > { %v689_v48 = vld [vmem:[%s455_s12 + $0x8] sm:$0xff] }
 0x17f   : > { %690 = vst [vmem:[%s656_s20 + $0x10] sm:$0xff] %v689_v48 }
 0x180   : > { %v687_v47 = vld [vmem:[%s455_s12] sm:$0xff] }
 0x181   : > { %688 = vst [vmem:[%s656_s20] sm:$0xff] %v687_v47 }
 0x182 PF: > { %s15_s24 = sadd.s32 1, %s1015_s24   ;;  %s1177_s18 = smov 0  }
 0x183   : > { %p12_p3 = scmp.ge.s32.totalorder %s15_s24, 4   ;;  %s1179_s19 = smov 0  }
 0x184   : > { %s1204_s20 = smov %s1003_s21  ;;  %s1205_s21 = smov %s1097_s28 }
 0x185   : > { %s1206_s22 = smov %s1011_s23  ;;  %s1207_s23 = smov %s1209_s25 }
 0x186   :  { %14 = sbr.rel (!%p12_p3) target bundleno = 4 (0x4), region = 249 }

</bundles_post_ra>
